<compile_context>
chip_gen: v6e
topology: v6e:2x2x1
jax: 0.10.0
libtpu: 0.0.40
codegen_flags: <defaults>
</compile_context>

<pallas_src>
import random

import jax
import jax.numpy as jnp
import numpy as np
from jax.experimental import pallas as pl
from jax.experimental.pallas import tpu as pltpu


def _round_up(x, m):
    return (x + m - 1) // m * m


def mean_agg_kernel(mask_ref, emb_ref, recip_ref, out_ref, acc_ref):
    """Accumulate one (TM, TK) x (TK, Dp) product; scale by 1/count at the end.

    mask_ref : [TM, TK] 0/1 float32 tile
    emb_ref  : [TK, Dp] float32 embedding tile
    recip_ref: [TM, 1]  float32, 1/num_neighbors per batch row (host-computed)
    out_ref  : [TM, Dp] float32 output tile
    acc_ref  : [TM, Dp] float32 VMEM accumulator scratch
    """
    k = pl.program_id(1)

    @pl.when(k == 0)
    def _():
        acc_ref[...] = jnp.zeros_like(acc_ref)

    acc_ref[...] += jnp.dot(
        mask_ref[...], emb_ref[...], preferred_element_type=jnp.float32
    )

    @pl.when(k == pl.num_programs(1) - 1)
    def _():
        # Post-matmul row normalization: (sum of neighbor embeddings) * (1/count).
        out_ref[...] = (acc_ref[...] * recip_ref[...]).astype(out_ref.dtype)


def mean_aggregate_pallas(mask_p, emb_p, recip_p, tm, tk):
    """mask_p: [Bp, Up], emb_p: [Up, Dp], recip_p: [Bp, 1] -> [Bp, Dp] (all f32)."""
    Bp, Up = mask_p.shape
    Up2, Dp = emb_p.shape
    assert Up == Up2 and Bp % tm == 0 and Up % tk == 0

    grid = (Bp // tm, Up // tk)

    # VMEM budget: double-buffered in/out blocks + accumulator scratch, with 2x
    # headroom, capped so it also fits v7x's 64 MiB physical VMEM per TensorCore.
    block_bytes = 4 * (2 * tm * tk + 2 * tk * Dp + 2 * tm * Dp + 2 * tm + tm * Dp)
    vmem_limit = int(min(max(2 * block_bytes, 16 << 20), 48 << 20))

    return pl.pallas_call(
        mean_agg_kernel,
        out_shape=jax.ShapeDtypeStruct((Bp, Dp), jnp.float32),
        grid_spec=pltpu.PrefetchScalarGridSpec(
            num_scalar_prefetch=0,
            grid=grid,
            in_specs=[
                pl.BlockSpec((tm, tk), lambda i, k: (i, k)),   # mask tile
                pl.BlockSpec((tk, Dp), lambda i, k: (k, 0)),   # embedding tile
                pl.BlockSpec((tm, 1), lambda i, k: (i, 0)),    # 1/count column
            ],
            out_specs=pl.BlockSpec((tm, Dp), lambda i, k: (i, 0)),
            scratch_shapes=[pltpu.VMEM((tm, Dp), jnp.float32)],
        ),
        compiler_params=pltpu.CompilerParams(
            dimension_semantics=("parallel", "arbitrary"),
            vmem_limit_bytes=vmem_limit,
        ),
    )(mask_p, emb_p, recip_p)


class MeanAggregatorPallas:
    """JAX/Pallas port of the GraphSAGE MeanAggregator forward pass.

    features: [num_nodes_total, D] embedding table (stands in for the `features`
    lookup function of the PyTorch module).
    """

    def __init__(self, features, gcn=False):
        features = jnp.asarray(features, jnp.float32)
        self.num_nodes, self.feat_dim = features.shape
        # Pad the feature dim to a lane multiple ONCE so per-call gathers are
        # already lane-aligned (no per-forward jnp.zeros().at[...].set()).
        self.dp = _round_up(max(self.feat_dim, 128), 128)
        if self.dp != self.feat_dim:
            features = jnp.pad(features, ((0, 0), (0, self.dp - self.feat_dim)))
        self.features = features
        self.gcn = gcn

    def forward(self, nodes, to_neighs, num_sample=10):
        # ------- host-side glue (same semantics as the PyTorch module) -------
        _set = set
        if num_sample is not None:
            _sample = random.sample
            # sorted() keeps random.sample valid on sets (Python >= 3.11) and
            # deterministic; the sampling distribution is unchanged.
            samp_neighs = [
                _set(_sample(sorted(to_neigh), num_sample))
                if len(to_neigh) >= num_sample
                else to_neigh
                for to_neigh in to_neighs
            ]
        else:
            samp_neighs = to_neighs
        if self.gcn:
            samp_neighs = [
                samp_neigh.union({int(nodes[i])})
                for i, samp_neigh in enumerate(samp_neighs)
            ]
        unique_nodes_list = list(set.union(*samp_neighs))
        unique_nodes = {n: i for i, n in enumerate(unique_nodes_list)}

        B = len(samp_neighs)
        U = len(unique_nodes_list)
        D = self.feat_dim

        # Tile sizes / padded shapes (all padding done host-side in numpy).
        bp8 = _round_up(max(B, 8), 8)
        tm = min(256, bp8)
        Bp = _round_up(bp8, tm)
        u128 = _round_up(max(U, 128), 128)
        tk = min(512, u128)
        Up = _round_up(u128, tk)

        # Dense 0/1 mask built directly at the padded shape.
        mask_p = np.zeros((Bp, Up), dtype=np.float32)
        column_indices = [
            unique_nodes[n] for samp_neigh in samp_neighs for n in samp_neigh
        ]
        row_indices = [
            i for i in range(len(samp_neighs)) for _ in range(len(samp_neighs[i]))
        ]
        mask_p[row_indices, column_indices] = 1.0

        # Reciprocal neighbor counts (row sums of the mask, known on the host).
        # max(.,1) guards empty / padded rows (PyTorch would produce NaN there).
        counts = np.ones((Bp, 1), dtype=np.float32)
        counts[:B, 0] = [max(len(sn), 1) for sn in samp_neighs]
        recip_p = (1.0 / counts).astype(np.float32)

        # Embedding lookup: pad the index list instead of the gathered matrix
        # (extra rows -> node 0; their mask columns are zero so they never count).
        idx = np.zeros((Up,), dtype=np.int32)
        idx[:U] = unique_nodes_list
        embed_matrix = jnp.take(self.features, jnp.asarray(idx), axis=0)  # [Up, Dp]

        # ------- hot path: tiled MXU matmul + post-matmul normalization -------
        out_p = mean_aggregate_pallas(
            jnp.asarray(mask_p), embed_matrix, jnp.asarray(recip_p), tm, tk
        )
        return out_p[:B, :D]


if __name__ == "__main__":
    # deterministic setup
    random.seed(0)
    key = jax.random.PRNGKey(0)

    num_nodes_total = 64
    feat_dim = 32
    batch = 8
    num_sample = 10

    # synthetic embedding table = the `features` function of the module
    features = jax.random.normal(key, (num_nodes_total, feat_dim), dtype=jnp.float32)

    # synthetic graph: each batch node gets a random neighbor set
    nodes = list(range(batch))
    to_neighs = []
    for _ in range(batch):
        deg = random.randint(5, 20)
        to_neighs.append(set(random.sample(range(num_nodes_total), deg)))

    agg = MeanAggregatorPallas(features, gcn=False)

    # fix the sampling RNG state so kernel run and reference use identical samples
    random.seed(123)
    to_feats = jax.block_until_ready(agg.forward(nodes, to_neighs, num_sample))

    # pure numpy reference (same sampling, reproduced with the same seed)
    random.seed(123)
    samp_neighs = [
        set(random.sample(sorted(tn), num_sample)) if len(tn) >= num_sample else tn
        for tn in to_neighs
    ]
    unique_nodes_list = list(set.union(*samp_neighs))
    unique_nodes = {n: i for i, n in enumerate(unique_nodes_list)}
    ref_mask = np.zeros((batch, len(unique_nodes)), dtype=np.float32)
    for i, sn in enumerate(samp_neighs):
        for n in sn:
            ref_mask[i, unique_nodes[n]] = 1.0
    ref_mask = ref_mask / ref_mask.sum(axis=1, keepdims=True)
    ref_emb = np.asarray(features)[np.asarray(unique_nodes_list)]
    ref = ref_mask @ ref_emb

    np.testing.assert_allclose(np.asarray(to_feats), ref, rtol=1e-5, atol=1e-5)
    assert to_feats.shape == (batch, feat_dim)
    print("KERNEL_OK")
</pallas_src>

<mosaic_0001>
module attributes {stable_mosaic.version = 11 : i64} {
  func.func @mean_agg_kernel(%arg0: i32, %arg1: i32, %arg2: memref<8x128xf32, #tpu.memory_space<vmem>>, %arg3: memref<128x128xf32, #tpu.memory_space<vmem>>, %arg4: memref<8x1xf32, #tpu.memory_space<vmem>>, %arg5: memref<8x128xf32, #tpu.memory_space<vmem>>, %arg6: memref<8x128xf32, #tpu.memory_space<vmem>>) attributes {dimension_semantics = [#tpu.dimension_semantics<parallel>, #tpu.dimension_semantics<arbitrary>], iteration_bounds = array<i64: 1, 1>, scalar_prefetch = 0 : i64, scratch_operands = 1 : i64, tpu.core_type = #tpu.core_type<tc>, window_params = [{transform_indices = @transform_0, window_bounds = array<i64: 8, 128>}, {transform_indices = @transform_1, window_bounds = array<i64: 128, 128>}, {transform_indices = @transform_2, window_bounds = array<i64: 8, 1>}, {transform_indices = @transform_3, window_bounds = array<i64: 8, 128>}]} {
    %c0_i32 = arith.constant 0 : i32
    %0 = arith.cmpi eq, %arg1, %c0_i32 : i32
    %1 = arith.extui %0 : i1 to i32
    %c0_i32_0 = arith.constant 0 : i32
    %2 = arith.cmpi ne, %1, %c0_i32_0 : i32
    scf.if %2 {
      %cst_10 = arith.constant 0.000000e+00 : f32
      %12 = vector.broadcast %cst_10 : f32 to vector<8x128xf32>
      %c0_11 = arith.constant 0 : index
      %c0_12 = arith.constant 0 : index
      %13 = vector.load %arg6[%c0_11, %c0_12] : memref<8x128xf32, #tpu.memory_space<vmem>>, vector<8x128xf32>
      tpu.vector_store %arg6[%c0_11, %c0_12], %12 {strides = array<i32>} : memref<8x128xf32, #tpu.memory_space<vmem>>, vector<8x128xf32>,
    } else {
    }
    %c0 = arith.constant 0 : index
    %c0_1 = arith.constant 0 : index
    %3 = vector.load %arg6[%c0, %c0_1] : memref<8x128xf32, #tpu.memory_space<vmem>>, vector<8x128xf32>
    %c0_2 = arith.constant 0 : index
    %c0_3 = arith.constant 0 : index
    %4 = vector.load %arg2[%c0_2, %c0_3] : memref<8x128xf32, #tpu.memory_space<vmem>>, vector<8x128xf32>
    %c0_4 = arith.constant 0 : index
    %c0_5 = arith.constant 0 : index
    %5 = vector.load %arg3[%c0_4, %c0_5] : memref<128x128xf32, #tpu.memory_space<vmem>>, vector<128x128xf32>
    %cst = arith.constant dense<0.000000e+00> : vector<8x128xf32>
    %6 = tpu.matmul %4, %5, %cst {dimension_numbers = #tpu.dot_dimension_numbers<[1], [0], [0], [1], [0, 0, 1, 1], [], []>} : vector<8x128xf32>, vector<128x128xf32>, vector<8x128xf32> -> vector<8x128xf32>
    %7 = arith.addf %3, %6 : vector<8x128xf32>
    %c0_6 = arith.constant 0 : index
    %c0_7 = arith.constant 0 : index
    %8 = vector.load %arg6[%c0_6, %c0_7] : memref<8x128xf32, #tpu.memory_space<vmem>>, vector<8x128xf32>
    tpu.vector_store %arg6[%c0_6, %c0_7], %7 {strides = array<i32>} : memref<8x128xf32, #tpu.memory_space<vmem>>, vector<8x128xf32>,
    %c0_i32_8 = arith.constant 0 : i32
    %9 = arith.cmpi eq, %arg1, %c0_i32_8 : i32
    %10 = arith.extui %9 : i1 to i32
    %c0_i32_9 = arith.constant 0 : i32
    %11 = arith.cmpi ne, %10, %c0_i32_9 : i32
    scf.if %11 {
      %c0_10 = arith.constant 0 : index
      %c0_11 = arith.constant 0 : index
      %12 = vector.load %arg6[%c0_10, %c0_11] : memref<8x128xf32, #tpu.memory_space<vmem>>, vector<8x128xf32>
      %c0_12 = arith.constant 0 : index
      %c0_13 = arith.constant 0 : index
      %13 = vector.load %arg4[%c0_12, %c0_13] : memref<8x1xf32, #tpu.memory_space<vmem>>, vector<8x1xf32>
      %14 = vector.broadcast %13 : vector<8x1xf32> to vector<8x128xf32>
      %15 = arith.mulf %12, %14 : vector<8x128xf32>
      %c0_14 = arith.constant 0 : index
      %c0_15 = arith.constant 0 : index
      %16 = vector.load %arg5[%c0_14, %c0_15] : memref<8x128xf32, #tpu.memory_space<vmem>>, vector<8x128xf32>
      tpu.vector_store %arg5[%c0_14, %c0_15], %15 {strides = array<i32>} : memref<8x128xf32, #tpu.memory_space<vmem>>, vector<8x128xf32>,
    } else {
    }
    return
  }
  func.func @transform_0(%arg0: i32, %arg1: i32) -> (i32, i32) {
    %c0_i32 = arith.constant 0 : i32
    return %arg0, %arg1 : i32, i32
  }
  func.func @transform_1(%arg0: i32, %arg1: i32) -> (i32, i32) {
    %c0_i32 = arith.constant 0 : i32
    %c0_i32_0 = arith.constant 0 : i32
    return %arg1, %c0_i32 : i32, i32
  }
  func.func @transform_2(%arg0: i32, %arg1: i32) -> (i32, i32) {
    %c0_i32 = arith.constant 0 : i32
    %c0_i32_0 = arith.constant 0 : i32
    return %arg0, %c0_i32 : i32, i32
  }
  func.func @transform_3(%arg0: i32, %arg1: i32) -> (i32, i32) {
    %c0_i32 = arith.constant 0 : i32
    %c0_i32_0 = arith.constant 0 : i32
    return %arg0, %c0_i32 : i32, i32
  }
}

</mosaic_0001>

<bundles_post_ra>
// kernel: tpu_custom_call.1
= control target key start
LH: loop header
LB: loop body
LE: loop exit
PB: predicated region body
PF: predicated region fallthrough
CT: control target
= control target key end

     0   :  { %8 = vsyncpa [#allocation4], 0  ;;  %s294_s0 = inlined_call_operand.vmem [shape: f32[8,128], index: 0, kind: input, shape index: {}]   ;;  %s295_s1 = inlined_call_operand.hbm [shape: f32[128,128], index: 1, kind: input, shape index: {}]   ;;  %s296_s2 = inlined_call_operand.vmem [shape: f32[8,1], index: 2, kind: input, shape index: {}]   ;;  %s297_s3 = inlined_call_operand.hbm [shape: f32[8,128], index: 3, kind: output, shape index: {}]  }
   0x1   :  { %9 = vsyncpa [#allocation5], 0  ;;  %s255_s12 = smov [#allocation3]  }
   0x2   :  { %s17_s13 = sshll.u32 %s255_s12, 4  ;;  %s18_s13 = int_to_ptr.vmem [resolvable:$true] %s17_s13 }
   0x3   :  { %s219_s14 = scalar_lea.vmem %s18_s13, 2048  ;;  %p224_p1 = scmp.lt.s32.totalorder %s18_s13, %s18_s13 }
   0x4   :  { %p220_p0 = scmp.ne.s32.totalorder %s18_s13, %s219_s14  ;;  %p225_p2 = scmp.lt.s32.totalorder %s219_s14, %s219_s14 }
   0x6   :  { %p226_p3 = por %p225_p2, %p224_p1 }
   0x8   :  { %p227_p4 = pnand %p226_p3, %p220_p0 }
   0xa   :  { %230 = shalt.err (!%p227_p4)
}
   0xb   :  { %s256_s15 = smov 128   ;;  %s257_s16 = smov 8  }
   0xc   :  { %23 = dma.hbm_to_vmem [thread:$0]  %s295_s1, 2048, %s18_s13, [#allocation4], %s256_s15, %s256_s15, %s257_s16  }
   0xd   :  { %251 = dma.done.wait [#allocation4], 2048  }
   0xe   :  { %252 = vsyncadd [#allocation4], 4294965248  ;;  %v258_v0 = vmov 0.0   ;;  %vm259_vm0 = vmmov 0   ;;  %v260_v1 = vmov 0   ;;  %v51_v2 = vld [vmem:[#allocation3 + $0x78] sm:$0xff] }
   0xf   :  { %168 = vmatprep.subr.mxu0 %v258_v0  ;;  %200 = vmatprep.mubr.msk.f32.mxu0 %vm259_vm0, %v258_v0  ;;  %v50_v3 = vld [vmem:[#allocation3 + $0x70] sm:$0xff]  ;;  %v49_v4 = vld [vmem:[#allocation3 + $0x68] sm:$0xff]  ;;  %v48_v5 = vld [vmem:[#allocation3 + $0x60] sm:$0xff]  ;;  %s261_s21 = smov [#allocation6]  }
  0x10   :  { %210 = vset.pattern.permute.xlu0 %v260_v1  ;;  %169 = vmatpush3.msra.mxu0 %v51_v2  ;;  %v128_v6 = vld [vmem:[%s296_s2] sm:$0xff]  ;;  %v47_v7 = vld [vmem:[#allocation3 + $0x58] sm:$0xff]  ;;  %v46_v8 = vld [vmem:[#allocation3 + $0x50] sm:$0xff]  ;;  %s142_s22 = sshll.u32 %s261_s21, 4  ;;  %s143_s22 = int_to_ptr.vmem [resolvable:$true] %s142_s22 }
  0x11   :  { %170 = vmatprep.subr.mxu0 %v258_v0  ;;  %131 = vperm.xlu0 %210, %v128_v6   ;;  %v45_v9 = vld [vmem:[#allocation3 + $0x48] sm:$0xff]  ;;  %v44_v10 = vld [vmem:[#allocation3 + $0x40] sm:$0xff]  ;;  %v43_v11 = vld [vmem:[#allocation3 + $0x38] sm:$0xff]  ;;  %s231_s23 = scalar_lea.vmem %s143_s22, 128  ;;  %p236_p6 = scmp.lt.s32.totalorder %s143_s22, %s143_s22 }
  0x12   :  { %171 = vmatpush3.msra.mxu0 %v50_v3  ;;  %v42_v12 = vld [vmem:[#allocation3 + $0x30] sm:$0xff]  ;;  %v41_v13 = vld [vmem:[#allocation3 + $0x28] sm:$0xff]  ;;  %v40_v14 = vld [vmem:[#allocation3 + $0x20] sm:$0xff]  ;;  %p232_p5 = scmp.ne.s32.totalorder %s143_s22, %s231_s23  ;;  %p237_p7 = scmp.lt.s32.totalorder %s231_s23, %s231_s23 }
  0x13   :  { %172 = vmatprep.subr.mxu0 %v258_v0  ;;  %v39_v15 = vld [vmem:[#allocation3 + $0x18] sm:$0xff]  ;;  %v38_v16 = vld [vmem:[#allocation3 + $0x10] sm:$0xff]  ;;  %v37_v17 = vld [vmem:[#allocation3 + $0x8] sm:$0xff] }
  0x14   :  { %173 = vmatpush3.msra.mxu0 %v49_v4  ;;  %v36_v18 = vld [vmem:[#allocation3] sm:$0xff]  ;;  %p238_p8 = por %p237_p7, %p236_p6 }
  0x15   :  { %174 = vmatprep.subr.mxu0 %v258_v0  ;;  %v35_v19 = vld [vmem:[%s294_s0] sm:$0xff] }
  0x16   :  { %175 = vmatpush3.msra.mxu0 %v48_v5  ;;  %p239_p9 = pnand %p238_p8, %p232_p5 }
  0x17   :  { %176 = vmatprep.subr.mxu0 %v258_v0 }
  0x18   :  { %177 = vmatpush3.msra.mxu0 %v47_v7 }
  0x19   :  { %178 = vmatprep.subr.mxu0 %v258_v0 }
  0x1a   :  { %179 = vmatpush3.msra.mxu0 %v46_v8 }
  0x1b   :  { %180 = vmatprep.subr.mxu0 %v258_v0 }
  0x1c   :  { %181 = vmatpush3.msra.mxu0 %v45_v9 }
  0x1d   :  { %182 = vmatprep.subr.mxu0 %v258_v0 }
  0x1e   :  { %183 = vmatpush3.msra.mxu0 %v44_v10 }
  0x1f   :  { %184 = vmatprep.subr.mxu0 %v258_v0 }
  0x20   :  { %185 = vmatpush3.msra.mxu0 %v43_v11 }
  0x21   :  { %186 = vmatprep.subr.mxu0 %v258_v0 }
  0x22   :  { %187 = vmatpush3.msra.mxu0 %v42_v12 }
  0x23   :  { %188 = vmatprep.subr.mxu0 %v258_v0 }
  0x24   :  { %189 = vmatpush3.msra.mxu0 %v41_v13 }
  0x25   :  { %190 = vmatprep.subr.mxu0 %v258_v0 }
  0x26   :  { %191 = vmatpush3.msra.mxu0 %v40_v14 }
  0x27   :  { %192 = vmatprep.subr.mxu0 %v258_v0 }
  0x28   :  { %193 = vmatpush3.msra.mxu0 %v39_v15 }
  0x29   :  { %194 = vmatprep.subr.mxu0 %v258_v0 }
  0x2a   :  { %195 = vmatpush3.msra.mxu0 %v38_v16 }
  0x2b   :  { %196 = vmatprep.subr.mxu0 %v258_v0 }
  0x2c   :  { %197 = vmatpush3.msra.mxu0 %v37_v17 }
  0x2d   :  { %198 = vmatprep.subr.mxu0 %v258_v0 }
  0x2e   :  { %199 = vmatpush3.msra.mxu0 %v36_v18 }
  0x2f   :  { %201 = vmatmul.mubr.f32.vlgmr.msra.gmra.mxu0 %v35_v19 }
  0x8c   :  { %v132_v20 = vpop.permute.xlu0 %131 }
  0xef   :  { %v118_v21 = vpop.f32.mrf.mxu0 }
  0xf0   :  { %v134_v22 = vmul.f32 %v132_v20, %v118_v21 }
  0xf1   :  { %v202_v23 = vpop.f32.mrf.mxu0 }
  0xf2   :  { %135 = vst [vmem:[#allocation6] sm:$0xff] %v134_v22 }
  0xf3   :  { %242 = shalt.err (!%p239_p9)
}
  0xf4   :  { %145 = dma.vmem_to_hbm [thread:$0]  %s143_s22, 128, %s297_s3, [#allocation5]  }
  0xf5   :  { %253 = dma.done.wait [#allocation5], 128  }
  0xf6   :  { %254 = vsyncadd [#allocation5], 4294967168 }
  0xf7   :  { %149 = vsyncpa [#allocation4], 1 }
  0xf8   :  { %150 = vsyncpa [#allocation5], 1 }

</bundles_post_ra>
